<compile_context>
chip_gen: v5e
topology: v5e:2x2
jax: 0.10.0
libtpu: 0.0.40
codegen_flags: <defaults>
</compile_context>

<pallas_src>
import functools

import jax
import jax.numpy as jnp
from jax.experimental import pallas as pl
from jax.experimental.pallas import tpu as pltpu


# ---------------------------------------------------------------------------
# Pallas kernel
# ---------------------------------------------------------------------------

def _swiglu_mlp_kernel(x_ref, w1_ref, w2_ref, w3_ref, o_ref, acc_ref):
    # x_ref : (tm, C)     rows of the flattened input
    # w1/w2 : (C, ti)     gate / up projection columns for this intermediate tile
    # w3    : (ti, C)     down projection rows for this intermediate tile
    # o_ref : (tm, C)     lane-dense output slab (written once, on the last step)
    # acc   : (tm, C) f32 VMEM accumulator, resident across the intermediate axis
    j = pl.program_id(1)

    @pl.when(j == 0)
    def _():
        acc_ref[...] = jnp.zeros_like(acc_ref)

    x = x_ref[...]
    g = jnp.dot(x, w1_ref[...], preferred_element_type=jnp.float32)   # gate
    u = jnp.dot(x, w2_ref[...], preferred_element_type=jnp.float32)   # up
    h = (g * jax.nn.sigmoid(g)) * u                                    # SwiGLU (silu on EUP)
    acc_ref[...] += jnp.dot(h.astype(w3_ref.dtype), w3_ref[...],
                            preferred_element_type=jnp.float32)        # down proj

    @pl.when(j == pl.num_programs(1) - 1)
    def _():
        o_ref[...] = acc_ref[...].astype(o_ref.dtype)


def _pick_tile(dim, target, align):
    """Largest divisor of `dim` that is a multiple of `align` and <= target;
    full extent if dim <= target (a full-extent block is always legal)."""
    if dim <= target:
        return dim
    t = (target // align) * align
    while t >= align:
        if dim % t == 0:
            return t
        t -= align
    return dim  # fall back to full extent


def swiglu_mlp(x, w1_t, w2_t, w3_t, *, tm_target=128, ti_target=512):
    """y = silu(x @ w1_t) * (x @ w2_t) @ w3_t, fused in one Pallas kernel.

    x     : (B, T, C)
    w1_t  : (C, I)   (transposed nn.Linear weight, bias=False)
    w2_t  : (C, I)
    w3_t  : (I, C)
    """
    B, T, C = x.shape
    I = w1_t.shape[1]
    M = B * T
    x2 = x.reshape(M, C)

    tm = _pick_tile(M, tm_target, 8)      # row tile (sublane axis)
    ti = _pick_tile(I, ti_target, 128)    # intermediate tile (lane axis)
    grid = (M // tm, I // ti)

    itemsize = jnp.dtype(x.dtype).itemsize
    # double-buffered input/output tiles + f32 accumulator, with headroom;
    # keep within v7x's 64 MiB physical VMEM.
    tile_bytes = (tm * C + 2 * C * ti + ti * C + tm * C) * itemsize
    vmem_limit = min(64 * 1024 * 1024,
                     max(16 * 1024 * 1024, 2 * tile_bytes + tm * C * 4 + (2 << 20)))

    cost = pl.CostEstimate(
        flops=6 * M * C * I,                       # 2 gate/up matmuls + down proj
        transcendentals=M * I,                     # sigmoid exp
        bytes_accessed=(x2.size + w1_t.size + w2_t.size + w3_t.size + M * C)
        * itemsize,
    )

    out = pl.pallas_call(
        _swiglu_mlp_kernel,
        out_shape=jax.ShapeDtypeStruct((M, C), x.dtype),
        grid_spec=pltpu.PrefetchScalarGridSpec(
            num_scalar_prefetch=0,
            grid=grid,
            in_specs=[
                pl.BlockSpec((tm, C), lambda i, j: (i, 0)),   # x rows
                pl.BlockSpec((C, ti), lambda i, j: (0, j)),   # W1 columns
                pl.BlockSpec((C, ti), lambda i, j: (0, j)),   # W2 columns
                pl.BlockSpec((ti, C), lambda i, j: (j, 0)),   # W3 rows
            ],
            out_specs=pl.BlockSpec((tm, C), lambda i, j: (i, 0)),
            scratch_shapes=[pltpu.VMEM((tm, C), jnp.float32)],
        ),
        compiler_params=pltpu.CompilerParams(
            dimension_semantics=("parallel", "arbitrary"),
            vmem_limit_bytes=int(vmem_limit),
        ),
        cost_estimate=cost,
    )(x2, w1_t, w2_t, w3_t)

    return out.reshape(B, T, C)


# ---------------------------------------------------------------------------
# Pure-JAX reference (for a sanity check)
# ---------------------------------------------------------------------------

def reference(x, w1_t, w2_t, w3_t):
    B, T, C = x.shape
    x2 = x.reshape(B * T, C)
    hp = jax.lax.Precision.HIGHEST
    g = jnp.dot(x2, w1_t, precision=hp)
    u = jnp.dot(x2, w2_t, precision=hp)
    h = jax.nn.silu(g) * u
    y = jnp.dot(h, w3_t, precision=hp)
    return y.reshape(B, T, C)


# ---------------------------------------------------------------------------
# Main
# ---------------------------------------------------------------------------

if __name__ == "__main__":
    # small LLaMA-MLP-like config
    B, T = 2, 8
    n_embd = 128
    intermediate_size = 256

    key = jax.random.PRNGKey(0)
    k_x, k_w1, k_w2, k_w3 = jax.random.split(key, 4)

    x = jax.random.normal(k_x, (B, T, n_embd), dtype=jnp.float32)

    # nn.Linear weights are (out, in); stored transposed so y = x @ W^T
    w1 = jax.random.normal(k_w1, (intermediate_size, n_embd), jnp.float32) / jnp.sqrt(n_embd)
    w2 = jax.random.normal(k_w2, (intermediate_size, n_embd), jnp.float32) / jnp.sqrt(n_embd)
    w3 = jax.random.normal(k_w3, (n_embd, intermediate_size), jnp.float32) / jnp.sqrt(
        intermediate_size)

    w1_t, w2_t, w3_t = w1.T, w2.T, w3.T

    fwd = jax.jit(swiglu_mlp)
    y = fwd(x, w1_t, w2_t, w3_t)
    jax.block_until_ready(y)

    y_ref = reference(x, w1_t, w2_t, w3_t)
    assert y.shape == (B, T, n_embd)
    err = jnp.max(jnp.abs(y - y_ref))
    assert bool(jnp.allclose(y, y_ref, atol=2e-3, rtol=2e-3)), f"mismatch vs reference, max|err|={err}"

    print("KERNEL_OK")
</pallas_src>

<mosaic_0001>
module attributes {stable_mosaic.version = 11 : i64} {
  func.func @_swiglu_mlp_kernel(%arg0: i32, %arg1: i32, %arg2: memref<16x128xf32, #tpu.memory_space<vmem>>, %arg3: memref<128x256xf32, #tpu.memory_space<vmem>>, %arg4: memref<128x256xf32, #tpu.memory_space<vmem>>, %arg5: memref<256x128xf32, #tpu.memory_space<vmem>>, %arg6: memref<16x128xf32, #tpu.memory_space<vmem>>, %arg7: memref<16x128xf32, #tpu.memory_space<vmem>>) attributes {dimension_semantics = [#tpu.dimension_semantics<parallel>, #tpu.dimension_semantics<arbitrary>], iteration_bounds = array<i64: 1, 1>, scalar_prefetch = 0 : i64, scratch_operands = 1 : i64, tpu.core_type = #tpu.core_type<tc>, window_params = [{transform_indices = @transform_0, window_bounds = array<i64: 16, 128>}, {transform_indices = @transform_1, window_bounds = array<i64: 128, 256>}, {transform_indices = @transform_2, window_bounds = array<i64: 128, 256>}, {transform_indices = @transform_3, window_bounds = array<i64: 256, 128>}, {transform_indices = @transform_4, window_bounds = array<i64: 16, 128>}]} {
    %c0_i32 = arith.constant 0 : i32
    %0 = arith.cmpi eq, %arg1, %c0_i32 : i32
    %1 = arith.extui %0 : i1 to i32
    %c0_i32_0 = arith.constant 0 : i32
    %2 = arith.cmpi ne, %1, %c0_i32_0 : i32
    scf.if %2 {
      %cst_17 = arith.constant 0.000000e+00 : f32
      %23 = vector.broadcast %cst_17 : f32 to vector<16x128xf32>
      %c0_18 = arith.constant 0 : index
      %c0_19 = arith.constant 0 : index
      %24 = vector.load %arg7[%c0_18, %c0_19] : memref<16x128xf32, #tpu.memory_space<vmem>>, vector<16x128xf32>
      tpu.vector_store %arg7[%c0_18, %c0_19], %23 {strides = array<i32>} : memref<16x128xf32, #tpu.memory_space<vmem>>, vector<16x128xf32>,
    } else {
    }
    %c0 = arith.constant 0 : index
    %c0_1 = arith.constant 0 : index
    %3 = vector.load %arg2[%c0, %c0_1] : memref<16x128xf32, #tpu.memory_space<vmem>>, vector<16x128xf32>
    %c0_2 = arith.constant 0 : index
    %c0_3 = arith.constant 0 : index
    %4 = vector.load %arg3[%c0_2, %c0_3] : memref<128x256xf32, #tpu.memory_space<vmem>>, vector<128x256xf32>
    %cst = arith.constant dense<0.000000e+00> : vector<16x256xf32>
    %5 = tpu.matmul %3, %4, %cst {dimension_numbers = #tpu.dot_dimension_numbers<[1], [0], [0], [1], [0, 0, 1, 1], [], []>} : vector<16x128xf32>, vector<128x256xf32>, vector<16x256xf32> -> vector<16x256xf32>
    %c0_4 = arith.constant 0 : index
    %c0_5 = arith.constant 0 : index
    %6 = vector.load %arg4[%c0_4, %c0_5] : memref<128x256xf32, #tpu.memory_space<vmem>>, vector<128x256xf32>
    %cst_6 = arith.constant dense<0.000000e+00> : vector<16x256xf32>
    %7 = tpu.matmul %3, %6, %cst_6 {dimension_numbers = #tpu.dot_dimension_numbers<[1], [0], [0], [1], [0, 0, 1, 1], [], []>} : vector<16x128xf32>, vector<128x256xf32>, vector<16x256xf32> -> vector<16x256xf32>
    %8 = arith.negf %5 : vector<16x256xf32>
    %9 = math.exp %8 : vector<16x256xf32>
    %cst_7 = arith.constant 1.000000e+00 : f32
    %10 = vector.broadcast %cst_7 : f32 to vector<16x256xf32>
    %11 = arith.addf %10, %9 : vector<16x256xf32>
    %12 = arith.divf %10, %11 : vector<16x256xf32>
    %13 = arith.mulf %5, %12 : vector<16x256xf32>
    %14 = arith.mulf %13, %7 : vector<16x256xf32>
    %c0_8 = arith.constant 0 : index
    %c0_9 = arith.constant 0 : index
    %15 = vector.load %arg7[%c0_8, %c0_9] : memref<16x128xf32, #tpu.memory_space<vmem>>, vector<16x128xf32>
    %c0_10 = arith.constant 0 : index
    %c0_11 = arith.constant 0 : index
    %16 = vector.load %arg5[%c0_10, %c0_11] : memref<256x128xf32, #tpu.memory_space<vmem>>, vector<256x128xf32>
    %cst_12 = arith.constant dense<0.000000e+00> : vector<16x128xf32>
    %17 = tpu.matmul %14, %16, %cst_12 {dimension_numbers = #tpu.dot_dimension_numbers<[1], [0], [0], [1], [0, 0, 1, 1], [], []>} : vector<16x256xf32>, vector<256x128xf32>, vector<16x128xf32> -> vector<16x128xf32>
    %18 = arith.addf %15, %17 : vector<16x128xf32>
    %c0_13 = arith.constant 0 : index
    %c0_14 = arith.constant 0 : index
    %19 = vector.load %arg7[%c0_13, %c0_14] : memref<16x128xf32, #tpu.memory_space<vmem>>, vector<16x128xf32>
    tpu.vector_store %arg7[%c0_13, %c0_14], %18 {strides = array<i32>} : memref<16x128xf32, #tpu.memory_space<vmem>>, vector<16x128xf32>,
    %c0_i32_15 = arith.constant 0 : i32
    %20 = arith.cmpi eq, %arg1, %c0_i32_15 : i32
    %21 = arith.extui %20 : i1 to i32
    %c0_i32_16 = arith.constant 0 : i32
    %22 = arith.cmpi ne, %21, %c0_i32_16 : i32
    scf.if %22 {
      %c0_17 = arith.constant 0 : index
      %c0_18 = arith.constant 0 : index
      %23 = vector.load %arg7[%c0_17, %c0_18] : memref<16x128xf32, #tpu.memory_space<vmem>>, vector<16x128xf32>
      %c0_19 = arith.constant 0 : index
      %c0_20 = arith.constant 0 : index
      %24 = vector.load %arg6[%c0_19, %c0_20] : memref<16x128xf32, #tpu.memory_space<vmem>>, vector<16x128xf32>
      tpu.vector_store %arg6[%c0_19, %c0_20], %23 {strides = array<i32>} : memref<16x128xf32, #tpu.memory_space<vmem>>, vector<16x128xf32>,
    } else {
    }
    return
  }
  func.func @transform_0(%arg0: i32, %arg1: i32) -> (i32, i32) {
    %c0_i32 = arith.constant 0 : i32
    %c0_i32_0 = arith.constant 0 : i32
    return %arg0, %c0_i32 : i32, i32
  }
  func.func @transform_1(%arg0: i32, %arg1: i32) -> (i32, i32) {
    %c0_i32 = arith.constant 0 : i32
    %c0_i32_0 = arith.constant 0 : i32
    return %c0_i32, %arg1 : i32, i32
  }
  func.func @transform_2(%arg0: i32, %arg1: i32) -> (i32, i32) {
    %c0_i32 = arith.constant 0 : i32
    %c0_i32_0 = arith.constant 0 : i32
    return %c0_i32, %arg1 : i32, i32
  }
  func.func @transform_3(%arg0: i32, %arg1: i32) -> (i32, i32) {
    %c0_i32 = arith.constant 0 : i32
    %c0_i32_0 = arith.constant 0 : i32
    return %arg1, %c0_i32 : i32, i32
  }
  func.func @transform_4(%arg0: i32, %arg1: i32) -> (i32, i32) {
    %c0_i32 = arith.constant 0 : i32
    %c0_i32_0 = arith.constant 0 : i32
    return %arg0, %c0_i32 : i32, i32
  }
}

</mosaic_0001>

<bundles_post_ra>
// kernel: swiglu_mlp.1
= control target key start
LH: loop header
LB: loop body
LE: loop exit
PB: predicated region body
PF: predicated region fallthrough
CT: control target
= control target key end

     0   :  { %9 = vsyncpa [#allocation4], 0  ;;  %s704_s0 = inlined_call_operand.hbm [shape: f32[16,128], index: 0, kind: input, shape index: {}]   ;;  %s705_s1 = inlined_call_operand.hbm [shape: f32[128,256], index: 1, kind: input, shape index: {}]   ;;  %s706_s2 = inlined_call_operand.hbm [shape: f32[128,256], index: 2, kind: input, shape index: {}]   ;;  %s707_s3 = inlined_call_operand.hbm [shape: f32[256,128], index: 3, kind: input, shape index: {}]   ;;  %s708_s4 = inlined_call_operand.hbm [shape: f32[16,128], index: 4, kind: output, shape index: {}]  }
   0x1   :  { %10 = vsyncpa [#allocation7], 0 }
   0x2   :  { %11 = vsyncpa [#allocation10], 0  ;;  %s30_s17 = sshll.u32 %s705_s1, 4  ;;  %s31_s17 = int_to_ptr.hbm [resolvable:$true] %s30_s17 }
   0x3   :  { %12 = vsyncpa [#allocation5], 0  ;;  %s630_s18 = smov [#allocation6]   ;;  %s17_s22 = sshll.u32 %s704_s0, 4  ;;  %s18_s22 = int_to_ptr.hbm [resolvable:$true] %s17_s22 }
   0x4   :  { %s32_s19 = sshll.u32 %s630_s18, 4  ;;  %s631_s23 = smov 256   ;;  %s33_s19 = int_to_ptr.vmem [resolvable:$true] %s32_s19 }
   0x5   :  { %s632_s24 = smov 16   ;;  %s633_s25 = smov [#allocation3]  }
   0x6   :  { %38 = dma.hbm_to_vmem [thread:$0]  %s31_s17, 4096, %s33_s19, [#allocation7], %s631_s23, %s631_s23, %s632_s24  }
   0x7   :  { %s19_s26 = sshll.u32 %s633_s25, 4  ;;  %s634_s27 = smov 128   ;;  %s20_s26 = int_to_ptr.vmem [resolvable:$true] %s19_s26 }
   0x8   :  { %s635_s28 = smov 8   ;;  %s43_s30 = sshll.u32 %s706_s2, 4  ;;  %s44_s30 = int_to_ptr.hbm [resolvable:$true] %s43_s30 }
   0x9   :  { %25 = dma.hbm_to_vmem [thread:$0]  %s18_s22, 256, %s20_s26, [#allocation4], %s634_s27, %s634_s27, %s635_s28  }
   0xa   :  { %s636_s5 = smov [#allocation8]   ;;  %s56_s8 = sshll.u32 %s707_s3, 4  ;;  %s57_s8 = int_to_ptr.hbm [resolvable:$true] %s56_s8 }
   0xb   :  { %s45_s0 = sshll.u32 %s636_s5, 4  ;;  %s637_s9 = smov [#allocation9]   ;;  %s46_s0 = int_to_ptr.vmem [resolvable:$true] %s45_s0 }
   0xc   :  { %51 = dma.hbm_to_vmem [thread:$0]  %s44_s30, 4096, %s46_s0, [#allocation7], %s631_s23, %s631_s23, %s632_s24  }
   0xd   :  { %s58_s10 = sshll.u32 %s637_s9, 4  ;;  %s59_s10 = int_to_ptr.vmem [resolvable:$true] %s58_s10 }
   0xe   :  { %64 = dma.hbm_to_vmem [thread:$0]  %s57_s8, 4096, %s59_s10, [#allocation10], %s634_s27, %s634_s27, %s635_s28  }
   0xf   :  { %622 = dma.done.wait [#allocation4], 256  }
  0x10   :  { %623 = vsyncadd [#allocation4], 4294967040 }
  0x11   :  { %624 = dma.done.wait [#allocation7], 8192  }
  0x12   :  { %625 = vsyncadd [#allocation7], 4294959104 }
  0x13   :  { %626 = dma.done.wait [#allocation10], 4096  }
  0x14   :  { %627 = vsyncadd [#allocation10], 4294963200  ;;  %v119_v0 = vld [vmem:[#allocation6 + $0xf0] sm:$0xff]  ;;  %v120_v1 = vld [vmem:[#allocation6 + $0xf8] sm:$0xff]  ;;  %s638_s2 = smov [#allocation11]   ;;  %s426_s13 = sshll.u32 %s708_s4, 4  ;;  %s427_s13 = int_to_ptr.hbm [resolvable:$true] %s426_s13 }
  0x15   :  { %v117_v2 = vld [vmem:[#allocation6 + $0xe0] sm:$0xff]  ;;  %121 = vmatpush.msra.mxu0 %v119_v0  ;;  %144 = vmatpush.msra.mxu1 %v120_v1  ;;  %v118_v3 = vld [vmem:[#allocation6 + $0xe8] sm:$0xff]  ;;  %v115_v4 = vld [vmem:[#allocation6 + $0xd0] sm:$0xff]  ;;  %s424_s3 = sshll.u32 %s638_s2, 4  ;;  %s425_s3 = int_to_ptr.vmem [resolvable:$true] %s424_s3 }
  0x16   :  { %v116_v5 = vld [vmem:[#allocation6 + $0xd8] sm:$0xff]  ;;  %v113_v6 = vld [vmem:[#allocation6 + $0xc0] sm:$0xff]  ;;  %v114_v7 = vld [vmem:[#allocation6 + $0xc8] sm:$0xff] }
  0x17   :  { %122 = vmatpush.msra.mxu0 %v117_v2  ;;  %145 = vmatpush.msra.mxu1 %v118_v3  ;;  %v111_v8 = vld [vmem:[#allocation6 + $0xb0] sm:$0xff]  ;;  %v112_v9 = vld [vmem:[#allocation6 + $0xb8] sm:$0xff]  ;;  %v109_v10 = vld [vmem:[#allocation6 + $0xa0] sm:$0xff] }
  0x18   :  { %v110_v11 = vld [vmem:[#allocation6 + $0xa8] sm:$0xff]  ;;  %v197_v12 = vld [vmem:[#allocation8 + $0xf0] sm:$0xff]  ;;  %v198_v14 = vld [vmem:[#allocation8 + $0xf8] sm:$0xff] }
  0x19   :  { %123 = vmatpush.msra.mxu0 %v115_v4  ;;  %146 = vmatpush.msra.mxu1 %v116_v5  ;;  %v107_v13 = vld [vmem:[#allocation6 + $0x90] sm:$0xff]  ;;  %v108_v15 = vld [vmem:[#allocation6 + $0x98] sm:$0xff]  ;;  %v195_v16 = vld [vmem:[#allocation8 + $0xe0] sm:$0xff] }
  0x1a   :  { %199 = vmatpush.msra.mxu2 %v197_v12  ;;  %222 = vmatpush.msra.mxu3 %v198_v14  ;;  %v196_v17 = vld [vmem:[#allocation8 + $0xe8] sm:$0xff]  ;;  %v193_v18 = vld [vmem:[#allocation8 + $0xd0] sm:$0xff]  ;;  %v194_v19 = vld [vmem:[#allocation8 + $0xd8] sm:$0xff] }
  0x1b   :  { %124 = vmatpush.msra.mxu0 %v113_v6  ;;  %147 = vmatpush.msra.mxu1 %v114_v7  ;;  %v105_v20 = vld [vmem:[#allocation6 + $0x80] sm:$0xff]  ;;  %v106_v21 = vld [vmem:[#allocation6 + $0x88] sm:$0xff]  ;;  %v103_v24 = vld [vmem:[#allocation6 + $0x70] sm:$0xff] }
  0x1c   :  { %200 = vmatpush.msra.mxu2 %v195_v16  ;;  %223 = vmatpush.msra.mxu3 %v196_v17  ;;  %v191_v22 = vld [vmem:[#allocation8 + $0xc0] sm:$0xff]  ;;  %v192_v23 = vld [vmem:[#allocation8 + $0xc8] sm:$0xff]  ;;  %v104_v25 = vld [vmem:[#allocation6 + $0x78] sm:$0xff] }
  0x1d   :  { %125 = vmatpush.msra.mxu0 %v111_v8  ;;  %148 = vmatpush.msra.mxu1 %v112_v9  ;;  %v189_v26 = vld [vmem:[#allocation8 + $0xb0] sm:$0xff]  ;;  %v190_v27 = vld [vmem:[#allocation8 + $0xb8] sm:$0xff]  ;;  %v101_v28 = vld [vmem:[#allocation6 + $0x60] sm:$0xff] }
  0x1e   :  { %201 = vmatpush.msra.mxu2 %v193_v18  ;;  %224 = vmatpush.msra.mxu3 %v194_v19  ;;  %v102_v29 = vld [vmem:[#allocation6 + $0x68] sm:$0xff]  ;;  %v187_v30 = vld [vmem:[#allocation8 + $0xa0] sm:$0xff]  ;;  %v99_v32 = vld [vmem:[#allocation6 + $0x50] sm:$0xff] }
  0x1f   :  { %126 = vmatpush.msra.mxu0 %v109_v10  ;;  %149 = vmatpush.msra.mxu1 %v110_v11  ;;  %v188_v31 = vld [vmem:[#allocation8 + $0xa8] sm:$0xff]  ;;  %v100_v33 = vld [vmem:[#allocation6 + $0x58] sm:$0xff]  ;;  %v185_v34 = vld [vmem:[#allocation8 + $0x90] sm:$0xff] }
  0x20   :  { %202 = vmatpush.msra.mxu2 %v191_v22  ;;  %225 = vmatpush.msra.mxu3 %v192_v23  ;;  %v186_v35 = vld [vmem:[#allocation8 + $0x98] sm:$0xff]  ;;  %v97_v36 = vld [vmem:[#allocation6 + $0x40] sm:$0xff]  ;;  %v98_v37 = vld [vmem:[#allocation6 + $0x48] sm:$0xff] }
  0x21   :  { %127 = vmatpush.msra.mxu0 %v107_v13  ;;  %150 = vmatpush.msra.mxu1 %v108_v15  ;;  %v183_v38 = vld [vmem:[#allocation8 + $0x80] sm:$0xff]  ;;  %v184_v39 = vld [vmem:[#allocation8 + $0x88] sm:$0xff]  ;;  %v95_v40 = vld [vmem:[#allocation6 + $0x30] sm:$0xff] }
  0x22   :  { %203 = vmatpush.msra.mxu2 %v189_v26  ;;  %226 = vmatpush.msra.mxu3 %v190_v27  ;;  %v96_v41 = vld [vmem:[#allocation6 + $0x38] sm:$0xff]  ;;  %v181_v42 = vld [vmem:[#allocation8 + $0x70] sm:$0xff]  ;;  %v93_v44 = vld [vmem:[#allocation6 + $0x20] sm:$0xff] }
  0x23   :  { %128 = vmatpush.msra.mxu0 %v105_v20  ;;  %151 = vmatpush.msra.mxu1 %v106_v21  ;;  %v182_v43 = vld [vmem:[#allocation8 + $0x78] sm:$0xff]  ;;  %v94_v45 = vld [vmem:[#allocation6 + $0x28] sm:$0xff]  ;;  %v179_v46 = vld [vmem:[#allocation8 + $0x60] sm:$0xff] }
  0x24   :  { %204 = vmatpush.msra.mxu2 %v187_v30  ;;  %227 = vmatpush.msra.mxu3 %v188_v31  ;;  %v180_v47 = vld [vmem:[#allocation8 + $0x68] sm:$0xff]  ;;  %v91_v48 = vld [vmem:[#allocation6 + $0x10] sm:$0xff]  ;;  %v92_v49 = vld [vmem:[#allocation6 + $0x18] sm:$0xff] }
  0x25   :  { %129 = vmatpush.msra.mxu0 %v103_v24  ;;  %152 = vmatpush.msra.mxu1 %v104_v25  ;;  %v177_v50 = vld [vmem:[#allocation8 + $0x50] sm:$0xff]  ;;  %v178_v51 = vld [vmem:[#allocation8 + $0x58] sm:$0xff]  ;;  %v89_v52 = vld [vmem:[#allocation6] sm:$0xff] }
  0x26   :  { %205 = vmatpush.msra.mxu2 %v185_v34  ;;  %228 = vmatpush.msra.mxu3 %v186_v35  ;;  %v90_v53 = vld [vmem:[#allocation6 + $0x8] sm:$0xff]  ;;  %v87_v54 = vld [vmem:[#allocation3] sm:$0xff]  ;;  %v175_v55 = vld [vmem:[#allocation8 + $0x40] sm:$0xff] }
  0x27   :  { %130 = vmatpush.msra.mxu0 %v101_v28  ;;  %153 = vmatpush.msra.mxu1 %v102_v29  ;;  %v176_v56 = vld [vmem:[#allocation8 + $0x48] sm:$0xff]  ;;  %v173_v57 = vld [vmem:[#allocation8 + $0x30] sm:$0xff]  ;;  %v174_v58 = vld [vmem:[#allocation8 + $0x38] sm:$0xff] }
  0x28   :  { %206 = vmatpush.msra.mxu2 %v183_v38  ;;  %229 = vmatpush.msra.mxu3 %v184_v39  ;;  %v171_v59 = vld [vmem:[#allocation8 + $0x20] sm:$0xff]  ;;  %v172_v60 = vld [vmem:[#allocation8 + $0x28] sm:$0xff]  ;;  %v169_v61 = vld [vmem:[#allocation8 + $0x10] sm:$0xff] }
  0x29   :  { %131 = vmatpush.msra.mxu0 %v99_v32  ;;  %154 = vmatpush.msra.mxu1 %v100_v33  ;;  %v170_v62 = vld [vmem:[#allocation8 + $0x18] sm:$0xff]  ;;  %v167_v0 = vld [vmem:[#allocation8] sm:$0xff]  ;;  %v168_v1 = vld [vmem:[#allocation8 + $0x8] sm:$0xff] }
  0x2a   :  { %207 = vmatpush.msra.mxu2 %v181_v42  ;;  %230 = vmatpush.msra.mxu3 %v182_v43  ;;  %v88_v63 = vld [vmem:[#allocation3 + $0x8] sm:$0xff]  ;;  %v345_v4 = vld [vmem:[#allocation9 + $0x70] sm:$0xff]  ;;  %v344_v6 = vld [vmem:[#allocation9 + $0x68] sm:$0xff] }
  0x2b   :  { %132 = vmatpush.msra.mxu0 %v97_v36  ;;  %155 = vmatpush.msra.mxu1 %v98_v37  ;;  %v346_v2 = vld [vmem:[#allocation9 + $0x78] sm:$0xff]  ;;  %v361_v5 = vld [vmem:[#allocation9 + $0xf0] sm:$0xff]  ;;  %v360_v7 = vld [vmem:[#allocation9 + $0xe8] sm:$0xff] }
  0x2c   :  { %208 = vmatpush.msra.mxu2 %v179_v46  ;;  %231 = vmatpush.msra.mxu3 %v180_v47  ;;  %v362_v3 = vld [vmem:[#allocation9 + $0xf8] sm:$0xff]  ;;  %v343_v8 = vld [vmem:[#allocation9 + $0x60] sm:$0xff]  ;;  %v341_v12 = vld [vmem:[#allocation9 + $0x50] sm:$0xff] }
  0x2d   :  { %133 = vmatpush.msra.mxu0 %v95_v40  ;;  %156 = vmatpush.msra.mxu1 %v96_v41  ;;  %v359_v9 = vld [vmem:[#allocation9 + $0xe0] sm:$0xff]  ;;  %v342_v10 = vld [vmem:[#allocation9 + $0x58] sm:$0xff]  ;;  %v357_v13 = vld [vmem:[#allocation9 + $0xd0] sm:$0xff] }
  0x2e   :  { %209 = vmatpush.msra.mxu2 %v177_v50  ;;  %232 = vmatpush.msra.mxu3 %v178_v51  ;;  %v358_v11 = vld [vmem:[#allocation9 + $0xd8] sm:$0xff]  ;;  %v340_v14 = vld [vmem:[#allocation9 + $0x48] sm:$0xff]  ;;  %v339_v16 = vld [vmem:[#allocation9 + $0x40] sm:$0xff] }
  0x2f   :  { %134 = vmatpush.msra.mxu0 %v93_v44  ;;  %157 = vmatpush.msra.mxu1 %v94_v45  ;;  %v356_v15 = vld [vmem:[#allocation9 + $0xc8] sm:$0xff]  ;;  %v355_v17 = vld [vmem:[#allocation9 + $0xc0] sm:$0xff]  ;;  %v338_v18 = vld [vmem:[#allocation9 + $0x38] sm:$0xff] }
  0x30   :  { %210 = vmatpush.msra.mxu2 %v175_v55  ;;  %233 = vmatpush.msra.mxu3 %v176_v56  ;;  %v354_v19 = vld [vmem:[#allocation9 + $0xb8] sm:$0xff]  ;;  %v337_v20 = vld [vmem:[#allocation9 + $0x30] sm:$0xff]  ;;  %v336_v22 = vld [vmem:[#allocation9 + $0x28] sm:$0xff] }
  0x31   :  { %135 = vmatpush.msra.mxu0 %v91_v48  ;;  %158 = vmatpush.msra.mxu1 %v92_v49  ;;  %v353_v21 = vld [vmem:[#allocation9 + $0xb0] sm:$0xff]  ;;  %v352_v23 = vld [vmem:[#allocation9 + $0xa8] sm:$0xff]  ;;  %v335_v24 = vld [vmem:[#allocation9 + $0x20] sm:$0xff] }
  0x32   :  { %211 = vmatpush.msra.mxu2 %v173_v57  ;;  %234 = vmatpush.msra.mxu3 %v174_v58  ;;  %v351_v25 = vld [vmem:[#allocation9 + $0xa0] sm:$0xff]  ;;  %v334_v26 = vld [vmem:[#allocation9 + $0x18] sm:$0xff]  ;;  %v333_v28 = vld [vmem:[#allocation9 + $0x10] sm:$0xff] }
  0x33   :  { %136 = vmatpush.msra.mxu0 %v89_v52  ;;  %159 = vmatpush.msra.mxu1 %v90_v53  ;;  %v350_v27 = vld [vmem:[#allocation9 + $0x98] sm:$0xff]  ;;  %v349_v29 = vld [vmem:[#allocation9 + $0x90] sm:$0xff]  ;;  %v332_v34 = vld [vmem:[#allocation9 + $0x8] sm:$0xff] }
  0x34   :  { %137 = vmatmul.f32.vlgmr.msra.gmra.mxu0 %v87_v54  ;;  %160 = vmatmul.f32.vlgmr.msra.gmra.mxu1 %v87_v54  ;;  %v348_v35 = vld [vmem:[#allocation9 + $0x88] sm:$0xff]  ;;  %v331_v36 = vld [vmem:[#allocation9] sm:$0xff] }
  0x35   :  { %212 = vmatpush.msra.mxu2 %v171_v59  ;;  %235 = vmatpush.msra.mxu3 %v172_v60  ;;  %v347_v37 = vld [vmem:[#allocation9 + $0x80] sm:$0xff] }
  0x36   :  { %363 = vmatpush.msrb.mxu0 %v346_v2  ;;  %386 = vmatpush.msrb.mxu1 %v362_v3 }
  0x37   :  { %213 = vmatpush.msra.mxu2 %v169_v61  ;;  %236 = vmatpush.msra.mxu3 %v170_v62 }
  0x38   :  { %364 = vmatpush.msrb.mxu0 %v345_v4  ;;  %387 = vmatpush.msrb.mxu1 %v361_v5 }
  0x39   :  { %214 = vmatpush.msra.mxu2 %v167_v0  ;;  %237 = vmatpush.msra.mxu3 %v168_v1 }
  0x3a   :  { %215 = vmatmul.f32.vlgmr.msra.gmra.mxu2 %v87_v54  ;;  %238 = vmatmul.f32.vlgmr.msra.gmra.mxu3 %v87_v54 }
  0x3b   :  { %445 = vmatpush.msrb.mxu2 %v346_v2  ;;  %461 = vmatpush.msrb.mxu3 %v362_v3 }
  0x3c   :  { %140 = vmatmul.f32.gmra.mxu0 %v88_v63  ;;  %163 = vmatmul.f32.gmra.mxu1 %v88_v63 }
  0x3d   :  { %446 = vmatpush.msrb.mxu2 %v345_v4  ;;  %462 = vmatpush.msrb.mxu3 %v361_v5 }
  0x3e   :  { %365 = vmatpush.msrb.mxu0 %v344_v6  ;;  %388 = vmatpush.msrb.mxu1 %v360_v7 }
  0x3f   :  { %447 = vmatpush.msrb.mxu2 %v344_v6  ;;  %463 = vmatpush.msrb.mxu3 %v360_v7 }
  0x40   :  { %366 = vmatpush.msrb.mxu0 %v343_v8  ;;  %389 = vmatpush.msrb.mxu1 %v359_v9 }
  0x41   :  { %448 = vmatpush.msrb.mxu2 %v343_v8  ;;  %464 = vmatpush.msrb.mxu3 %v359_v9 }
  0x42   :  { %218 = vmatmul.f32.gmra.mxu2 %v88_v63  ;;  %241 = vmatmul.f32.gmra.mxu3 %v88_v63 }
  0x43   :  { %367 = vmatpush.msrb.mxu0 %v342_v10  ;;  %390 = vmatpush.msrb.mxu1 %v358_v11 }
  0x44   :  { %449 = vmatpush.msrb.mxu2 %v342_v10  ;;  %465 = vmatpush.msrb.mxu3 %v358_v11 }
  0x45   :  { %368 = vmatpush.msrb.mxu0 %v341_v12  ;;  %391 = vmatpush.msrb.mxu1 %v357_v13 }
  0x46   :  { %450 = vmatpush.msrb.mxu2 %v341_v12  ;;  %466 = vmatpush.msrb.mxu3 %v357_v13 }
  0x47   :  { %369 = vmatpush.msrb.mxu0 %v340_v14  ;;  %392 = vmatpush.msrb.mxu1 %v356_v15 }
  0x48   :  { %451 = vmatpush.msrb.mxu2 %v340_v14  ;;  %467 = vmatpush.msrb.mxu3 %v356_v15 }
  0x49   :  { %370 = vmatpush.msrb.mxu0 %v339_v16  ;;  %393 = vmatpush.msrb.mxu1 %v355_v17 }
  0x4a   :  { %452 = vmatpush.msrb.mxu2 %v339_v16  ;;  %468 = vmatpush.msrb.mxu3 %v355_v17 }
  0x4b   :  { %371 = vmatpush.msrb.mxu0 %v338_v18  ;;  %394 = vmatpush.msrb.mxu1 %v354_v19 }
  0x4c   :  { %453 = vmatpush.msrb.mxu2 %v338_v18  ;;  %469 = vmatpush.msrb.mxu3 %v354_v19 }
  0x4d   :  { %372 = vmatpush.msrb.mxu0 %v337_v20  ;;  %395 = vmatpush.msrb.mxu1 %v353_v21 }
  0x4e   :  { %454 = vmatpush.msrb.mxu2 %v337_v20  ;;  %470 = vmatpush.msrb.mxu3 %v353_v21 }
  0x4f   :  { %373 = vmatpush.msrb.mxu0 %v336_v22  ;;  %396 = vmatpush.msrb.mxu1 %v352_v23 }
  0x50   :  { %455 = vmatpush.msrb.mxu2 %v336_v22  ;;  %471 = vmatpush.msrb.mxu3 %v352_v23 }
  0x51   :  { %374 = vmatpush.msrb.mxu0 %v335_v24  ;;  %397 = vmatpush.msrb.mxu1 %v351_v25 }
  0x52   :  { %456 = vmatpush.msrb.mxu2 %v335_v24  ;;  %472 = vmatpush.msrb.mxu3 %v351_v25 }
  0x53   :  { %375 = vmatpush.msrb.mxu0 %v334_v26  ;;  %398 = vmatpush.msrb.mxu1 %v350_v27 }
  0x54   :  { %457 = vmatpush.msrb.mxu2 %v334_v26  ;;  %473 = vmatpush.msrb.mxu3 %v350_v27 }
  0x55   :  { %376 = vmatpush.msrb.mxu0 %v333_v28  ;;  %399 = vmatpush.msrb.mxu1 %v349_v29 }
  0x56   :  { %458 = vmatpush.msrb.mxu2 %v333_v28  ;;  %474 = vmatpush.msrb.mxu3 %v349_v29 }
  0x57   :  { %377 = vmatpush.msrb.mxu0 %v332_v34  ;;  %400 = vmatpush.msrb.mxu1 %v348_v35 }
  0x58   :  { %459 = vmatpush.msrb.mxu2 %v332_v34  ;;  %475 = vmatpush.msrb.mxu3 %v348_v35 }
  0x59   :  { %378 = vmatpush.msrb.mxu0 %v331_v36  ;;  %401 = vmatpush.msrb.mxu1 %v347_v37 }
  0x5a   :  { %460 = vmatpush.msrb.mxu2 %v331_v36  ;;  %476 = vmatpush.msrb.mxu3 %v347_v37 }
  0xb1   :  { %v682_v30 = vpop.f32.mrf.mxu0  ;;  %v684_v31 = vpop.f32.mrf.mxu1 }
  0xb2   :  { %v441_v32 = vmul.f32 -1.442695, %v682_v30  ;;  %v442_v33 = vmul.f32 -1.442695, %v684_v31 }
  0xb4   :  { %486 = vpow2.f32 %v441_v32 }
  0xb5   :  { %488 = vpow2.f32 %v442_v33 }
  0xb9   :  { %v688_v38 = vpop.f32.mrf.mxu0  ;;  %v690_v39 = vpop.f32.mrf.mxu1 }
  0xba   :  { %v487_v40 = vpop.eup %486  ;;  %v443_v41 = vmul.f32 -1.442695, %v688_v38  ;;  %v444_v44 = vmul.f32 -1.442695, %v690_v39 }
  0xbb   :  { %v489_v42 = vpop.eup %488  ;;  %v257_v43 = vadd.f32 1.0, %v487_v40 }
  0xbc   :  { %v258_v45 = vadd.f32 1.0, %v489_v42  ;;  %490 = vpow2.f32 %v443_v41 }
  0xbd   :  { %492 = vrcp.f32 %v257_v43  ;;  %v270_v55 = vand.u32 2147483647, %v257_v43  ;;  %v272_v56 = vand.u32 2147483648, %v257_v43  ;;  %vm266_vm2 = vweird.f32 %v257_v43  ;;  %v216_v2 = vpop.f32.mrf.mxu2  ;;  %v239_v12 = vpop.f32.mrf.mxu3 }
  0xbe   :  { %494 = vrcp.f32 %v258_v45  ;;  %v287_v59 = vand.u32 2147483648, %v258_v45  ;;  %v285_v61 = vand.u32 2147483647, %v258_v45  ;;  %vm281_vm4 = vweird.f32 %v258_v45 }
  0xbf   :  { %496 = vpow2.f32 %v444_v44  ;;  %v273_v0 = vor.u32 1.1754944e-38, %v272_v56  ;;  %vm271_vm5 = vcmp.eq.f32.partialorder %v270_v55, 8.507059e+37 }
  0xc0   :  { %v288_v4 = vor.u32 1.1754944e-38, %v287_v59  ;;  %vm286_vm7 = vcmp.eq.f32.partialorder %v285_v61, 8.507059e+37 }
  0xc2   :  { %v491_v46 = vpop.eup %490 }
  0xc3   :  { %v493_v47 = vpop.eup %492  ;;  %v259_v48 = vadd.f32 1.0, %v491_v46 }
  0xc4   :  { %v495_v49 = vpop.eup %494  ;;  %v262_v50 = vmul.f32 %v493_v47, %v257_v43  ;;  %vm267_vm0 = vweird.f32 %v493_v47 }
  0xc5   :  { %v497_v51 = vpop.eup %496  ;;  %v277_v52 = vmul.f32 %v495_v49, %v258_v45  ;;  %498 = vrcp.f32 %v259_v48  ;;  %vm282_vm1 = vweird.f32 %v495_v49  ;;  %vm268_vm3 = vmor %vm266_vm2, %vm267_vm0  ;;  %v302_v14 = vand.u32 2147483648, %v259_v48  ;;  %v219_v29 = vpop.f32.mrf.mxu2 }
  0xc6   :  { %v263_v53 = vsub.f32 1.0, %v262_v50  ;;  %v260_v54 = vadd.f32 1.0, %v497_v51  ;;  %vm283_vm6 = vmor %vm281_vm4, %vm282_vm1  ;;  %v300_v17 = vand.u32 2147483647, %v259_v48  ;;  %vm296_vm9 = vweird.f32 %v259_v48  ;;  %v242_v35 = vpop.f32.mrf.mxu3 }
  0xc7   :  { %v278_v57 = vsub.f32 1.0, %v277_v52  ;;  %v303_v23 = vor.u32 1.1754944e-38, %v302_v14 }
  0xc8   :  { %v264_v58 = vmul.f32 %v493_v47, %v263_v53  ;;  %500 = vrcp.f32 %v260_v54  ;;  %v317_v22 = vand.u32 2147483648, %v260_v54  ;;  %v315_v25 = vand.u32 2147483647, %v260_v54 }
  0xc9   :  { %v279_v60 = vmul.f32 %v495_v49, %v278_v57  ;;  %vm301_vm12 = vcmp.eq.f32.partialorder %v300_v17, 8.507059e+37  ;;  %vm311_vm13 = vweird.f32 %v260_v54 }
  0xca   :  { %v265_v62 = vadd.f32 %v493_v47, %v264_v58  ;;  %vm316_vm15 = vcmp.eq.f32.partialorder %v315_v25, 8.507059e+37 }
  0xcb   :  { %v499_v63 = vpop.eup %498  ;;  %v280_v1 = vadd.f32 %v495_v49, %v279_v60 }
  0xcc   :  { %v269_v3 = vsel %vm268_vm3, %v493_v47, %v265_v62  ;;  %v292_v5 = vmul.f32 %v499_v63, %v259_v48  ;;  %vm297_vm8 = vweird.f32 %v499_v63 }
  0xcd   :  { %v274_v6 = vsel %vm271_vm5, %v273_v0, %v269_v3  ;;  %v284_v7 = vsel %vm283_vm6, %v495_v49, %v280_v1  ;;  %vm298_vm10 = vmor %vm296_vm9, %vm297_vm8 }
  0xce   :  { %v501_v8 = vpop.eup %500  ;;  %v321_v9 = vmul.f32 %v274_v6, %v682_v30  ;;  %v289_v10 = vsel %vm286_vm7, %v288_v4, %v284_v7  ;;  %v293_v11 = vsub.f32 1.0, %v292_v5 }
  0xcf   :  { %v322_v13 = vmul.f32 %v289_v10, %v684_v31  ;;  %v307_v15 = vmul.f32 %v501_v8, %v260_v54  ;;  %vm312_vm11 = vweird.f32 %v501_v8  ;;  %v318_v31 = vor.u32 1.1754944e-38, %v317_v22 }
  0xd0   :  { %v294_v16 = vmul.f32 %v499_v63, %v293_v11  ;;  %v325_v18 = vmul.f32 %v321_v9, %v216_v2  ;;  %vm313_vm14 = vmor %vm311_vm13, %vm312_vm11 }
  0xd1   :  { %v308_v19 = vsub.f32 1.0, %v307_v15  ;;  %v326_v20 = vmul.f32 %v322_v13, %v239_v12 }
  0xd2   :  { %v295_v21 = vadd.f32 %v499_v63, %v294_v16  ;;  %379 = vmatmul.f32.vlgmr.msrb.gmra.mxu0 %v325_v18 }
  0xd3   :  { %v309_v24 = vmul.f32 %v501_v8, %v308_v19  ;;  %402 = vmatmul.f32.vlgmr.msrb.gmra.mxu1 %v326_v20 }
  0xd4   :  { %v299_v26 = vsel %vm298_vm10, %v499_v63, %v295_v21 }
  0xd5   :  { %v304_v27 = vsel %vm301_vm12, %v303_v23, %v299_v26  ;;  %v310_v28 = vadd.f32 %v501_v8, %v309_v24 }
  0xd6   :  { %v323_v30 = vmul.f32 %v304_v27, %v688_v38 }
  0xd7   :  { %v314_v32 = vsel %vm313_vm14, %v501_v8, %v310_v28 }
  0xd8   :  { %v319_v33 = vsel %vm316_vm15, %v318_v31, %v314_v32  ;;  %v327_v34 = vmul.f32 %v323_v30, %v219_v29 }
  0xd9   :  { %v324_v36 = vmul.f32 %v319_v33, %v690_v39 }
  0xda   :  { %382 = vmatmul.f32.vlgmr.msrb.gmra.mxu2 %v327_v34 }
  0xdb   :  { %v328_v37 = vmul.f32 %v324_v36, %v242_v35 }
  0xdd   :  { %405 = vmatmul.f32.vlgmr.msrb.gmra.mxu3 %v328_v37 }
 0x14f   :  { %v380_v40 = vpop.f32.mrf.mxu0 }
 0x150   :  { %v403_v41 = vpop.f32.mrf.mxu1 }
 0x151   :  { %v404_v42 = vadd.f32 %v403_v41, %v380_v40 }
 0x153   :  { %418 = vst [vmem:[#allocation11] sm:$0xff] %v404_v42 }
 0x15d   :  { %v383_v43 = vpop.f32.mrf.mxu2 }
 0x160   :  { %v406_v38 = vpop.f32.mrf.mxu3 }
 0x161   :  { %v407_v44 = vadd.f32 %v406_v38, %v383_v43 }
 0x163   :  { %419 = vst [vmem:[#allocation11 + $0x8] sm:$0xff] %v407_v44 }
 0x164   :  { %432 = dma.vmem_to_hbm [thread:$0]  %s425_s3, 256, %s427_s13, [#allocation5], %s634_s27, %s634_s27, %s635_s28  }
 0x165   :  { %628 = dma.done.wait [#allocation5], 256  }
 0x166   :  { %629 = vsyncadd [#allocation5], 4294967040 }
 0x167   :  { %437 = vsyncpa [#allocation4], 1 }
 0x168   :  { %438 = vsyncpa [#allocation7], 1 }
 0x169   :  { %439 = vsyncpa [#allocation10], 1 }
 0x16a   :  { %440 = vsyncpa [#allocation5], 1 }

</bundles_post_ra>
